<compile_context>
chip_gen: v6e
topology: v6e:2x2x1
jax: 0.10.0
libtpu: 0.0.40
codegen_flags: <defaults>
</compile_context>

<pallas_src>
import math

import numpy as np
import jax
import jax.numpy as jnp
from jax import lax
from jax.experimental import pallas as pl
from jax.experimental.pallas import tpu as pltpu

# ---------------------------------------------------------------------------
# Parameters (mirrors GaussianBlurConv.__init__; cv2.getGaussianKernel
# reimplemented in numpy).
# ---------------------------------------------------------------------------
TRUNCATE = 4
SIGMA = 1.5
SIZE = 2 * int(TRUNCATE * SIGMA + 0.5) + 1  # = 13
PAD = (SIZE - 1) // 2                       # = 6


def _get_gaussian_kernel_1d(size, sigma):
    """numpy reimplementation of cv2.getGaussianKernel(size, sigma)."""
    i = np.arange(size, dtype=np.float64)
    center = (size - 1) / 2.0
    k = np.exp(-((i - center) ** 2) / (2.0 * sigma ** 2))
    return k / k.sum()


def fspecial_gaussian(size, sigma):
    k1d = _get_gaussian_kernel_1d(size, sigma)
    return np.outer(k1d, k1d)


K1D = _get_gaussian_kernel_1d(SIZE, SIGMA)
KERNEL_2D = fspecial_gaussian(SIZE, SIGMA).astype(np.float32)


# ---------------------------------------------------------------------------
# Trace-time band matrices (encode the zero padding of F.conv2d).
# ---------------------------------------------------------------------------
def _band_right(n):
    """B with (x @ B)[:, j] = sum_a x[:, a] * K1D[a - j + PAD]  (conv along last axis)."""
    b = np.zeros((n, n), np.float64)
    for a in range(n):
        for j in range(max(0, a - PAD), min(n, a + PAD + 1)):
            b[a, j] = K1D[a - j + PAD]
    return b.astype(np.float32)


def _band_left(n):
    """B with (B @ x)[i, :] = sum_k K1D[k - i + PAD] * x[k, :]  (conv along first axis)."""
    b = np.zeros((n, n), np.float64)
    for i in range(n):
        for k in range(max(0, i - PAD), min(n, i + PAD + 1)):
            b[i, k] = K1D[k - i + PAD]
    return b.astype(np.float32)


def _block_diag(b, p):
    """p copies of b on the diagonal -> keeps lane-packed channels independent."""
    n = b.shape[0]
    out = np.zeros((p * n, p * n), np.float32)
    for i in range(p):
        out[i * n:(i + 1) * n, i * n:(i + 1) * n] = b
    return out


# ---------------------------------------------------------------------------
# Pallas kernel.
#   x_ref : (R, H, P*W) input block  (R packed groups, P channels per group
#           laid out side by side along the 128-lane axis)
#   bh_ref: (H, H)      vertical band matrix
#   bw_ref: (P*W, P*W)  block-diagonal horizontal band matrix
#   o_ref : (R, H, P*W) output block
# Both 13-tap passes are MXU matmuls; padding is built into the band matrices.
# ---------------------------------------------------------------------------
def _blur_kernel(x_ref, bh_ref, bw_ref, o_ref):
    bh = bh_ref[...]
    bw = bw_ref[...]
    r_blk = x_ref.shape[0]
    for r in range(r_blk):  # small static unroll
        h = jnp.dot(x_ref[r], bw,
                    preferred_element_type=jnp.float32,
                    precision=lax.Precision.HIGHEST)
        o_ref[r] = jnp.dot(bh, h,
                           preferred_element_type=jnp.float32,
                           precision=lax.Precision.HIGHEST).astype(o_ref.dtype)


# ---------------------------------------------------------------------------
# Block-size pickers.
# ---------------------------------------------------------------------------
def _lane_pack_factor(w):
    """How many channels to pack along the lane axis so the last dim is
    128-aligned (lane-dense stores), with a cap on the band-matrix size."""
    if w % 128 == 0:
        return 1
    lcm = w * 128 // math.gcd(w, 128)
    if lcm <= 1024:                 # (P*W)^2 f32 band matrix stays <= 4 MiB
        return lcm // w
    return max(1, 512 // w)         # give up exact alignment, still widen lanes


def _groups_per_step(g, group_bytes, block_budget=8 << 20):
    """Largest divisor of g fitting the per-step budget while keeping >= 2
    grid steps (megacore) whenever g allows it."""
    r_cap = max(1, block_budget // max(group_bytes, 1))
    best = 1
    for r in range(1, min(r_cap, g) + 1):
        if g % r:
            continue
        if g >= 2 and g // r < 2:
            continue
        best = r
    return best


def _vmem_limit(block_bytes, const_bytes):
    # double-buffered in + out blocks + band matrices + headroom, capped for v7x
    need = 4 * block_bytes + 2 * const_bytes + (4 << 20)
    return int(min(max(need, 32 << 20), 48 << 20))


# ---------------------------------------------------------------------------
# Wrapper: same semantics as GaussianBlurConv.forward.
# ---------------------------------------------------------------------------
def gaussian_blur_conv(x):
    """Depthwise Gaussian blur.  x: (N, C, H, W) float32 -> (N, C, H, W) float32."""
    x = x.astype(jnp.float32)
    N, C, H, W = x.shape
    NC = N * C

    P = _lane_pack_factor(W)
    G = -(-NC // P)                 # ceil(NC / P) packed groups
    NCp = G * P
    PW = P * W

    xr = x.reshape(NC, H, W)
    if NCp != NC:                   # tail handling: pad channels with zeros
        xr = jnp.concatenate(
            [xr, jnp.zeros((NCp - NC, H, W), jnp.float32)], axis=0)

    # lane-dense packing: (G, P, H, W) -> (G, H, P, W) -> (G, H, P*W)
    xp = xr.reshape(G, P, H, W).transpose(0, 2, 1, 3).reshape(G, H, PW)

    bh = jnp.asarray(_band_left(H))                       # (H, H)
    bw = jnp.asarray(_block_diag(_band_right(W), P))      # (P*W, P*W)

    group_bytes = H * PW * 4
    R = _groups_per_step(G, group_bytes)
    grid = (G // R,)
    block_bytes = R * group_bytes
    const_bytes = int(bh.size * 4 + bw.size * 4)

    out = pl.pallas_call(
        _blur_kernel,
        out_shape=jax.ShapeDtypeStruct((G, H, PW), jnp.float32),
        grid_spec=pltpu.PrefetchScalarGridSpec(
            num_scalar_prefetch=0,
            grid=grid,
            in_specs=[
                pl.BlockSpec((R, H, PW), lambda i: (i, 0, 0)),
                pl.BlockSpec((H, H), lambda i: (0, 0)),
                pl.BlockSpec((PW, PW), lambda i: (0, 0)),
            ],
            out_specs=pl.BlockSpec((R, H, PW), lambda i: (i, 0, 0)),
        ),
        compiler_params=pltpu.CompilerParams(
            dimension_semantics=("parallel",),
            vmem_limit_bytes=_vmem_limit(block_bytes, const_bytes),
        ),
    )(xp, bh, bw)

    # unpack lanes back to (N, C, H, W)
    out = out.reshape(G, H, P, W).transpose(0, 2, 1, 3).reshape(NCp, H, W)
    return out[:NC].reshape(N, C, H, W)


# ---------------------------------------------------------------------------
# Reference: direct 2D depthwise convolution with zero padding, computed in
# numpy with float64 accumulation (exactly the F.conv2d semantics).
# ---------------------------------------------------------------------------
def _reference_numpy(x_np):
    N, C, H, W = x_np.shape
    xp = np.pad(x_np.astype(np.float64),
                ((0, 0), (0, 0), (PAD, PAD), (PAD, PAD)))
    out = np.zeros((N, C, H, W), dtype=np.float64)
    for di in range(SIZE):
        for dj in range(SIZE):
            out += float(KERNEL_2D[di, dj]) * xp[:, :, di:di + H, dj:dj + W]
    return out.astype(np.float32)


if __name__ == "__main__":
    key = jax.random.PRNGKey(0)
    x = jax.random.normal(key, (2, 4, 16, 16), dtype=jnp.float32)

    y = jax.block_until_ready(gaussian_blur_conv(x))

    y_ref = _reference_numpy(np.asarray(x))
    np.testing.assert_allclose(np.asarray(y), y_ref, rtol=1e-5, atol=1e-5)

    print("KERNEL_OK")
</pallas_src>

<mosaic_0001>
module attributes {stable_mosaic.version = 11 : i64} {
  func.func @_blur_kernel(%arg0: i32, %arg1: memref<1x16x128xf32, #tpu.memory_space<vmem>>, %arg2: memref<16x16xf32, #tpu.memory_space<vmem>>, %arg3: memref<128x128xf32, #tpu.memory_space<vmem>>, %arg4: memref<1x16x128xf32, #tpu.memory_space<vmem>>) attributes {dimension_semantics = [#tpu.dimension_semantics<parallel>], iteration_bounds = array<i64: 1>, scalar_prefetch = 0 : i64, scratch_operands = 0 : i64, tpu.core_type = #tpu.core_type<tc>, window_params = [{transform_indices = @transform_0, window_bounds = array<i64: 1, 16, 128>}, {pipeline_mode = #tpu.pipeline_mode<synchronous>, transform_indices = @transform_1, window_bounds = array<i64: 16, 16>}, {pipeline_mode = #tpu.pipeline_mode<synchronous>, transform_indices = @transform_2, window_bounds = array<i64: 128, 128>}, {transform_indices = @transform_3, window_bounds = array<i64: 1, 16, 128>}]} {
    %c0 = arith.constant 0 : index
    %c0_0 = arith.constant 0 : index
    %0 = vector.load %arg2[%c0, %c0_0] : memref<16x16xf32, #tpu.memory_space<vmem>>, vector<16x16xf32>
    %c0_1 = arith.constant 0 : index
    %c0_2 = arith.constant 0 : index
    %1 = vector.load %arg3[%c0_1, %c0_2] : memref<128x128xf32, #tpu.memory_space<vmem>>, vector<128x128xf32>
    %c0_3 = arith.constant 0 : index
    %c0_4 = arith.constant 0 : index
    %c0_5 = arith.constant 0 : index
    %2 = vector.load %arg1[%c0_3, %c0_4, %c0_5] : memref<1x16x128xf32, #tpu.memory_space<vmem>>, vector<1x16x128xf32>
    %3 = vector.shape_cast %2 : vector<1x16x128xf32> to vector<16x128xf32>
    %cst = arith.constant dense<0.000000e+00> : vector<16x128xf32>
    %4 = tpu.matmul %3, %1, %cst {dimension_numbers = #tpu.dot_dimension_numbers<[1], [0], [0], [1], [0, 0, 1, 1], [], []>, precision = #tpu.contract_precision<fp32>} : vector<16x128xf32>, vector<128x128xf32>, vector<16x128xf32> -> vector<16x128xf32>
    %cst_6 = arith.constant dense<0.000000e+00> : vector<16x128xf32>
    %5 = tpu.matmul %0, %4, %cst_6 {dimension_numbers = #tpu.dot_dimension_numbers<[1], [0], [0], [1], [0, 0, 1, 1], [], []>, precision = #tpu.contract_precision<fp32>} : vector<16x16xf32>, vector<16x128xf32>, vector<16x128xf32> -> vector<16x128xf32>
    %c0_7 = arith.constant 0 : index
    %c0_8 = arith.constant 0 : index
    %c0_9 = arith.constant 0 : index
    %6 = vector.load %arg4[%c0_7, %c0_8, %c0_9] : memref<1x16x128xf32, #tpu.memory_space<vmem>>, vector<1x16x128xf32>
    %7 = vector.shape_cast %6 : vector<1x16x128xf32> to vector<16x128xf32>
    %8 = vector.shape_cast %5 : vector<16x128xf32> to vector<1x16x128xf32>
    tpu.vector_store %arg4[%c0_7, %c0_8, %c0_9], %8 {strides = array<i32>} : memref<1x16x128xf32, #tpu.memory_space<vmem>>, vector<1x16x128xf32>,
    return
  }
  func.func @transform_0(%arg0: i32) -> (i32, i32, i32) {
    %c0_i32 = arith.constant 0 : i32
    %c0_i32_0 = arith.constant 0 : i32
    %c0_i32_1 = arith.constant 0 : i32
    return %arg0, %c0_i32, %c0_i32_0 : i32, i32, i32
  }
  func.func @transform_1(%arg0: i32) -> (i32, i32) {
    %c0_i32 = arith.constant 0 : i32
    %c0_i32_0 = arith.constant 0 : i32
    %c0_i32_1 = arith.constant 0 : i32
    return %c0_i32, %c0_i32_0 : i32, i32
  }
  func.func @transform_2(%arg0: i32) -> (i32, i32) {
    %c0_i32 = arith.constant 0 : i32
    %c0_i32_0 = arith.constant 0 : i32
    %c0_i32_1 = arith.constant 0 : i32
    return %c0_i32, %c0_i32_0 : i32, i32
  }
  func.func @transform_3(%arg0: i32) -> (i32, i32, i32) {
    %c0_i32 = arith.constant 0 : i32
    %c0_i32_0 = arith.constant 0 : i32
    %c0_i32_1 = arith.constant 0 : i32
    return %arg0, %c0_i32, %c0_i32_0 : i32, i32, i32
  }
}

</mosaic_0001>

<bundles_post_ra>
// kernel: tpu_custom_call.1
= control target key start
LH: loop header
LB: loop body
LE: loop exit
PB: predicated region body
PF: predicated region fallthrough
CT: control target
= control target key end

     0   :  { %8 = vsyncpa [#allocation3], 0  ;;  %s2186_s0 = inlined_call_operand.hbm [shape: f32[1,16,128], index: 0, kind: input, shape index: {}]   ;;  %s2187_s1 = inlined_call_operand.hbm [shape: f32[16,16], index: 1, kind: input, shape index: {}]   ;;  %s2188_s2 = inlined_call_operand.hbm [shape: f32[128,128], index: 2, kind: input, shape index: {}]   ;;  %s2189_s3 = inlined_call_operand.hbm [shape: f32[1,16,128], index: 3, kind: output, shape index: {}]  }
   0x1   :  { %9 = vsyncpa [#allocation6], 0 }
   0x2   :  { %10 = vsyncpa [#allocation4], 0  ;;  %s1765_s12 = smov [#allocation5]   ;;  %s1766_s14 = smov [#allocation2]  }
   0x3   :  { %s28_s13 = sshll.u32 %s1765_s12, 4  ;;  %s16_s15 = sshll.u32 %s1766_s14, 4  ;;  %s29_s13 = int_to_ptr.vmem [resolvable:$true] %s28_s13  ;;  %s17_s15 = int_to_ptr.vmem [resolvable:$true] %s16_s15 }
   0x4   :  { %s1687_s16 = scalar_lea.vmem %s29_s13, 256  ;;  %p1692_p1 = scmp.lt.s32.totalorder %s29_s13, %s29_s13 }
   0x5   :  { %p1688_p0 = scmp.ne.s32.totalorder %s29_s13, %s1687_s16  ;;  %p1693_p2 = scmp.lt.s32.totalorder %s1687_s16, %s1687_s16 }
   0x7   :  { %p1694_p3 = por %p1693_p2, %p1692_p1 }
   0x9   :  { %p1695_p4 = pnand %p1694_p3, %p1688_p0 }
   0xb   :  { %1698 = shalt.err (!%p1695_p4)
}
   0xc   :  { %s1767_s17 = smov 128   ;;  %s1768_s18 = smov 8  }
   0xd   :  { %34 = dma.hbm_to_vmem [thread:$0]  %s2187_s1, 256, %s29_s13, [#allocation6], %s1767_s17, %s1767_s17, %s1768_s18  }
   0xe   :  { %s1707_s21 = scalar_lea.vmem %s17_s15, 256  ;;  %p1712_p6 = scmp.lt.s32.totalorder %s17_s15, %s17_s15 }
   0xf   :  { %p1708_p5 = scmp.ne.s32.totalorder %s17_s15, %s1707_s21  ;;  %p1713_p7 = scmp.lt.s32.totalorder %s1707_s21, %s1707_s21 }
  0x11   :  { %p1714_p8 = por %p1713_p7, %p1712_p6 }
  0x13   :  { %p1715_p9 = pnand %p1714_p8, %p1708_p5 }
  0x15   :  { %1718 = shalt.err (!%p1715_p9)
}
  0x16   :  { %22 = dma.hbm_to_vmem [thread:$0]  %s2186_s0, 256, %s17_s15, [#allocation3], %s1767_s17, %s1767_s17, %s1768_s18  }
  0x17   :  { %s1769_s24 = smov [#allocation7]  }
  0x18   :  { %s40_s25 = sshll.u32 %s1769_s24, 4  ;;  %s41_s25 = int_to_ptr.vmem [resolvable:$true] %s40_s25 }
  0x19   :  { %s1727_s26 = scalar_lea.vmem %s41_s25, 2048  ;;  %p1732_p11 = scmp.lt.s32.totalorder %s41_s25, %s41_s25 }
  0x1a   :  { %p1728_p10 = scmp.ne.s32.totalorder %s41_s25, %s1727_s26  ;;  %p1733_p12 = scmp.lt.s32.totalorder %s1727_s26, %s1727_s26 }
  0x1c   :  { %p1734_p13 = por %p1733_p12, %p1732_p11 }
  0x1e   :  { %p1735_p0 = pnand %p1734_p13, %p1728_p10 }
  0x20   :  { %1738 = shalt.err (!%p1735_p0)
}
  0x21   :  { %46 = dma.hbm_to_vmem [thread:$0]  %s2188_s2, 2048, %s41_s25, [#allocation6], %s1767_s17, %s1767_s17, %s1768_s18  }
  0x22   :  { %1759 = dma.done.wait [#allocation3], 256  }
  0x23   :  { %1760 = vsyncadd [#allocation3], 4294967040 }
  0x24   :  { %1761 = dma.done.wait [#allocation6], 2304  }
  0x25   :  { %1762 = vsyncadd [#allocation6], 4294964992  ;;  %v73_v0 = vld [vmem:[#allocation7 + $0x78] sm:$0xff]  ;;  %v72_v1 = vld [vmem:[#allocation7 + $0x70] sm:$0xff]  ;;  %vm760_vm0 = vcmask 130048   ;;  %s1770_s0 = smov [#allocation8]  }
  0x26   :  { %v71_v2 = vld [vmem:[#allocation7 + $0x68] sm:$0xff]  ;;  %v1809_v3 = vand.u32 4294901760, %v73_v0  ;;  %v1811_v4 = vand.u32 4294901760, %v72_v1  ;;  %v70_v6 = vld [vmem:[#allocation7 + $0x60] sm:$0xff]  ;;  %v69_v7 = vld [vmem:[#allocation7 + $0x58] sm:$0xff]  ;;  %s1276_s2 = sshll.u32 %s1770_s0, 4  ;;  %s1277_s2 = int_to_ptr.vmem [resolvable:$true] %s1276_s2 }
  0x27   :  { %v1813_v5 = vand.u32 4294901760, %v71_v2  ;;  %v68_v8 = vld [vmem:[#allocation7 + $0x50] sm:$0xff]  ;;  %v1815_v9 = vand.u32 4294901760, %v70_v6  ;;  %v1817_v10 = vand.u32 4294901760, %v69_v7  ;;  %v67_v12 = vld [vmem:[#allocation7 + $0x48] sm:$0xff]  ;;  %v66_v13 = vld [vmem:[#allocation7 + $0x40] sm:$0xff]  ;;  %p1744_p2 = scmp.lt.s32.totalorder %s1277_s2, %s1277_s2 }
  0x28   :  { %v1819_v11 = vand.u32 4294901760, %v68_v8  ;;  %1421 = vmatprep.subr.mxu0 %v1809_v3  ;;  %v1823_v14 = vsub.f32 %v73_v0, %v1809_v3  ;;  %v1826_v15 = vsub.f32 %v72_v1, %v1811_v4  ;;  %v1828_v16 = vand.u32 4294901760, %v67_v12  ;;  %v65_v18 = vld [vmem:[#allocation7 + $0x38] sm:$0xff]  ;;  %v64_v25 = vld [vmem:[#allocation7 + $0x30] sm:$0xff]  ;;  %v63_v35 = vld [vmem:[#allocation7 + $0x28] sm:$0xff]  ;;  %s1739_s28 = scalar_lea.vmem %s1277_s2, 256 }
  0x29   :  { %v1831_v17 = vsub.f32 %v71_v2, %v1813_v5  ;;  %1422 = vmatpush3.msra.mxu0 %v1809_v3  ;;  %v1835_v19 = vsub.f32 %v70_v6, %v1815_v9  ;;  %v1838_v20 = vsub.f32 %v69_v7, %v1817_v10  ;;  %v1850_v24 = vand.u32 4294901760, %v66_v13  ;;  %v62_v40 = vld [vmem:[#allocation7 + $0x20] sm:$0xff]  ;;  %v61_v48 = vld [vmem:[#allocation7 + $0x18] sm:$0xff]  ;;  %v75_v54 = vld [vmem:[#allocation2 + $0x8] sm:$0xff]  ;;  %p1740_p1 = scmp.ne.s32.totalorder %s1277_s2, %s1739_s28  ;;  %p1745_p3 = scmp.lt.s32.totalorder %s1739_s28, %s1739_s28 }
  0x2a   :  { %1423 = vmatprep.subr.mxu0 %v1811_v4  ;;  %v1842_v21 = vand.u32 4294901760, %v1823_v14  ;;  %v1845_v22 = vand.u32 4294901760, %v1826_v15  ;;  %v1856_v27 = vand.u32 4294901760, %v65_v18  ;;  %v1862_v29 = vsub.f32 %v68_v8, %v1819_v11  ;;  %v74_v49 = vld [vmem:[#allocation2] sm:$0xff]  ;;  %v60_v59 = vld [vmem:[#allocation7 + $0x10] sm:$0xff]  ;;  %v59_v2 = vld [vmem:[#allocation7 + $0x8] sm:$0xff] }
  0x2b   :  { %v1848_v23 = vand.u32 4294901760, %v1831_v17  ;;  %1424 = vmatpush3.msra.mxu0 %v1811_v4  ;;  %v1854_v26 = vand.u32 4294901760, %v1835_v19  ;;  %v1859_v28 = vand.u32 4294901760, %v1838_v20  ;;  %v1872_v33 = vsub.f32 %v67_v12, %v1828_v16  ;;  %p1746_p4 = por %p1745_p3, %p1744_p2 }
  0x2c   :  { %1425 = vmatprep.subr.mxu0 %v1813_v5  ;;  %v181_v30 = vsub.f32 %v1823_v14, %v1842_v21  ;;  %v188_v31 = vsub.f32 %v1826_v15, %v1845_v22  ;;  %v1875_v34 = vand.u32 4294901760, %v64_v25  ;;  %v1881_v39 = vand.u32 4294901760, %v1862_v29 }
  0x2d   :  { %v195_v32 = vsub.f32 %v1831_v17, %v1848_v23  ;;  %1426 = vmatpush3.msra.mxu0 %v1813_v5  ;;  %v202_v38 = vsub.f32 %v1835_v19, %v1854_v26  ;;  %v209_v41 = vsub.f32 %v1838_v20, %v1859_v28  ;;  %v1887_v42 = vand.u32 4294901760, %v1872_v33  ;;  %p1747_p5 = pnand %p1746_p4, %p1740_p1 }
  0x2e   :  { %1427 = vmatprep.subr.mxu0 %v1815_v9  ;;  %v182_v36 = vand.u32 4294901760, %v181_v30  ;;  %v189_v37 = vand.u32 4294901760, %v188_v31  ;;  %v1890_v43 = vsub.f32 %v66_v13, %v1850_v24  ;;  %v1893_v45 = vand.u32 4294901760, %v63_v35 }
  0x2f   :  { %1428 = vmatpush3.msra.mxu0 %v1815_v9  ;;  %v196_v44 = vand.u32 4294901760, %v195_v32  ;;  %v1896_v46 = vsub.f32 %v65_v18, %v1856_v27  ;;  %v1899_v47 = vand.u32 4294901760, %v62_v40  ;;  %v203_v50 = vand.u32 4294901760, %v202_v38  ;;  %v58_v18 = vld [vmem:[#allocation7] sm:$0xff] }
  0x30   :  { %1429 = vmatprep.subr.mxu0 %v1817_v10  ;;  %1456 = vmatprep.subr.mxu1 %v182_v36  ;;  %v216_v51 = vsub.f32 %v1862_v29, %v1881_v39  ;;  %v1905_v52 = vand.u32 4294901760, %v1890_v43  ;;  %v1908_v53 = vsub.f32 %v64_v25, %v1875_v34  ;;  %v210_v55 = vand.u32 4294901760, %v209_v41 }
  0x31   :  { %1430 = vmatpush3.msra.mxu0 %v1817_v10  ;;  %1457 = vmatpush3.msra.mxu1 %v182_v36  ;;  %v223_v56 = vsub.f32 %v1872_v33, %v1887_v42  ;;  %v1914_v57 = vand.u32 4294901760, %v61_v48  ;;  %v1917_v58 = vand.u32 4294901760, %v1896_v46  ;;  %v1920_v60 = vsub.f32 %v63_v35, %v1893_v45 }
  0x32   :  { %1431 = vmatprep.subr.mxu0 %v1819_v11  ;;  %1458 = vmatprep.subr.mxu1 %v189_v37  ;;  %v1922_v61 = vand.u32 4294901760, %v74_v49  ;;  %v1925_v62 = vand.u32 4294901760, %v75_v54  ;;  %v217_v63 = vand.u32 4294901760, %v216_v51  ;;  %v230_v0 = vsub.f32 %v1890_v43, %v1905_v52 }
  0x33   :  { %1432 = vmatpush3.msra.mxu0 %v1819_v11  ;;  %1459 = vmatpush3.msra.mxu1 %v189_v37  ;;  %v1931_v1 = vand.u32 4294901760, %v1908_v53  ;;  %v1934_v6 = vsub.f32 %v62_v40, %v1899_v47  ;;  %v224_v7 = vand.u32 4294901760, %v223_v56  ;;  %v1937_v8 = vand.u32 4294901760, %v60_v59 }
  0x34   :  { %1433 = vmatprep.subr.mxu0 %v1828_v16  ;;  %1460 = vmatprep.subr.mxu1 %v196_v44  ;;  %v237_v12 = vsub.f32 %v1896_v46, %v1917_v58  ;;  %v1943_v13 = vand.u32 4294901760, %v1920_v60  ;;  %v1946_v25 = vsub.f32 %v74_v49, %v1922_v61  ;;  %v1949_v30 = vsub.f32 %v61_v48, %v1914_v57 }
  0x35   :  { %1434 = vmatpush3.msra.mxu0 %v1828_v16  ;;  %1461 = vmatpush3.msra.mxu1 %v196_v44  ;;  %v1952_v31 = vand.u32 4294901760, %v59_v2  ;;  %v1955_v32 = vsub.f32 %v75_v54, %v1925_v62  ;;  %v231_v35 = vand.u32 4294901760, %v230_v0  ;;  %v244_v36 = vsub.f32 %v1908_v53, %v1931_v1 }
  0x36   :  { %1435 = vmatprep.subr.mxu0 %v1850_v24  ;;  %1462 = vmatprep.subr.mxu1 %v203_v50  ;;  %v1961_v37 = vand.u32 4294901760, %v1934_v6  ;;  %v1964_v38 = vand.u32 4294901760, %v58_v18  ;;  %v1967_v40 = vsub.f32 %v60_v59, %v1937_v8  ;;  %v238_v41 = vand.u32 4294901760, %v237_v12 }
  0x37   :  { %1436 = vmatpush3.msra.mxu0 %v1850_v24  ;;  %1463 = vmatpush3.msra.mxu1 %v203_v50  ;;  %v251_v44 = vsub.f32 %v1920_v60, %v1943_v13  ;;  %v2191_v48 = vand.u32 4294901760, %v1946_v25  ;;  %v1974_v49 = vand.u32 4294901760, %v1949_v30  ;;  %v2190_v50 = vand.u32 4294901760, %v1955_v32 }
  0x38   :  { %1437 = vmatprep.subr.mxu0 %v1856_v27  ;;  %1464 = vmatprep.subr.mxu1 %v210_v55  ;;  %v1979_v51 = vsub.f32 %v59_v2, %v1952_v31  ;;  %v245_v54 = vand.u32 4294901760, %v244_v36  ;;  %v1986_v56 = vand.u32 4294901760, %v1967_v40  ;;  %v1989_v59 = vsub.f32 %v58_v18, %v1964_v38 }
  0x39   :  { %1438 = vmatpush3.msra.mxu0 %v1856_v27  ;;  %1465 = vmatpush3.msra.mxu1 %v210_v55  ;;  %v258_v55 = vsub.f32 %v1934_v6, %v1961_v37  ;;  %v160_v0 = vsub.f32 %v1946_v25, %v2191_v48  ;;  %v265_v2 = vsub.f32 %v1949_v30, %v1974_v49 }
  0x3a   :  { %1439 = vmatprep.subr.mxu0 %v1875_v34  ;;  %1466 = vmatprep.subr.mxu1 %v217_v63  ;;  %v2002_v12 = vand.u32 4294901760, %v1979_v51  ;;  %v2009_v36 = vand.u32 4294901760, %v1989_v59 }
  0x3b   :  { %1440 = vmatpush3.msra.mxu0 %v1875_v34  ;;  %1467 = vmatpush3.msra.mxu1 %v217_v63  ;;  %v252_v63 = vand.u32 4294901760, %v251_v44  ;;  %v259_v18 = vand.u32 4294901760, %v258_v55  ;;  %v266_v44 = vand.u32 4294901760, %v265_v2 }
  0x3c   :  { %1441 = vmatprep.subr.mxu0 %v1893_v45  ;;  %1468 = vmatprep.subr.mxu1 %v224_v7  ;;  %v279_v55 = vsub.f32 %v1979_v51, %v2002_v12  ;;  %v286_v48 = vsub.f32 %v1989_v59, %v2009_v36 }
  0x3d   :  { %1442 = vmatpush3.msra.mxu0 %v1893_v45  ;;  %1469 = vmatpush3.msra.mxu1 %v224_v7  ;;  %v170_v7 = vsub.f32 %v1955_v32, %v2190_v50 }
  0x3e   :  { %1443 = vmatprep.subr.mxu0 %v1899_v47  ;;  %1470 = vmatprep.subr.mxu1 %v231_v35 }
  0x3f   :  { %1444 = vmatpush3.msra.mxu0 %v1899_v47  ;;  %1471 = vmatpush3.msra.mxu1 %v231_v35  ;;  %v272_v35 = vsub.f32 %v1967_v40, %v1986_v56  ;;  %v171_v50 = vand.u32 4294901760, %v170_v7 }
  0x40   :  { %1445 = vmatprep.subr.mxu0 %v1914_v57  ;;  %1472 = vmatprep.subr.mxu1 %v238_v41 }
  0x41   :  { %1446 = vmatpush3.msra.mxu0 %v1914_v57  ;;  %1473 = vmatpush3.msra.mxu1 %v238_v41  ;;  %v161_v41 = vand.u32 4294901760, %v160_v0  ;;  %v287_v0 = vand.u32 4294901760, %v286_v48 }
  0x42   :  { %1447 = vmatprep.subr.mxu0 %v1937_v8  ;;  %1474 = vmatprep.subr.mxu1 %v245_v54 }
  0x43   :  { %1448 = vmatpush3.msra.mxu0 %v1937_v8  ;;  %1475 = vmatpush3.msra.mxu1 %v245_v54  ;;  %v273_v54 = vand.u32 4294901760, %v272_v35 }
  0x44   :  { %1449 = vmatprep.subr.mxu0 %v1952_v31  ;;  %1476 = vmatprep.subr.mxu1 %v252_v63 }
  0x45   :  { %1450 = vmatpush3.msra.mxu0 %v1952_v31  ;;  %1477 = vmatpush3.msra.mxu1 %v252_v63  ;;  %v280_v63 = vand.u32 4294901760, %v279_v55 }
  0x46   :  { %1451 = vmatprep.subr.mxu0 %v1964_v38  ;;  %1478 = vmatprep.subr.mxu1 %v259_v18 }
  0x47   :  { %1452 = vmatpush3.msra.mxu0 %v1964_v38  ;;  %1479 = vmatpush3.msra.mxu1 %v259_v18 }
  0x48   :  { %1453 = vmatprep.mubr.f32.mxu0 %v161_v41  ;;  %1480 = vmatprep.subr.mxu1 %v266_v44 }
  0x49   :  { %1491 = vmatprep.subr.mxu0 %v1823_v14  ;;  %1454 = vmatmul.mubr.f32.vlgmr.msra.gmra.mxu0 %v171_v50 }
  0x4a   :  { %1481 = vmatpush3.msra.mxu1 %v266_v44  ;;  %1492 = vmatpush3.msra.mxu0 %v1823_v14  ;;  %v2192_v14 = vand.u32 4294901760, %v1946_v25 }
  0x4b   :  { %1482 = vmatprep.subr.mxu1 %v273_v54  ;;  %1493 = vmatprep.subr.mxu0 %v1826_v15 }
  0x4c   :  { %1483 = vmatpush3.msra.mxu1 %v273_v54  ;;  %1494 = vmatpush3.msra.mxu0 %v1826_v15  ;;  %v2193_v15 = vand.u32 4294901760, %v1955_v32 }
  0x4d   :  { %1484 = vmatprep.subr.mxu1 %v280_v63  ;;  %1495 = vmatprep.subr.mxu0 %v1831_v17 }
  0x4e   :  { %1485 = vmatpush3.msra.mxu1 %v280_v63  ;;  %1496 = vmatpush3.msra.mxu0 %v1831_v17 }
  0x4f   :  { %1486 = vmatprep.subr.mxu1 %v287_v0  ;;  %1497 = vmatprep.subr.mxu0 %v1835_v19 }
  0x50   :  { %1487 = vmatpush3.msra.mxu1 %v287_v0  ;;  %1488 = vmatprep.mubr.f32.mxu1 %v1922_v61 }
  0x51   :  { %1498 = vmatpush3.msra.mxu0 %v1835_v19  ;;  %1489 = vmatmul.mubr.f32.vlgmr.msra.gmra.mxu1 %v1925_v62  ;;  %v57_v19 = vld [vmem:[#allocation5 + $0x8] sm:$0xff] }
  0x52   :  { %1499 = vmatprep.subr.mxu0 %v1838_v20  ;;  %1526 = vmatprep.subr.mxu1 %v1809_v3 }
  0x53   :  { %1500 = vmatpush3.msra.mxu0 %v1838_v20  ;;  %1527 = vmatpush3.msra.mxu1 %v1809_v3 }
  0x54   :  { %1501 = vmatprep.subr.mxu0 %v1862_v29  ;;  %1528 = vmatprep.subr.mxu1 %v1811_v4 }
  0x55   :  { %1502 = vmatpush3.msra.mxu0 %v1862_v29  ;;  %1529 = vmatpush3.msra.mxu1 %v1811_v4 }
  0x56   :  { %1503 = vmatprep.subr.mxu0 %v1872_v33  ;;  %1530 = vmatprep.subr.mxu1 %v1813_v5 }
  0x57   :  { %1504 = vmatpush3.msra.mxu0 %v1872_v33  ;;  %1531 = vmatpush3.msra.mxu1 %v1813_v5 }
  0x58   :  { %1505 = vmatprep.subr.mxu0 %v1890_v43  ;;  %1532 = vmatprep.subr.mxu1 %v1815_v9 }
  0x59   :  { %1506 = vmatpush3.msra.mxu0 %v1890_v43  ;;  %1533 = vmatpush3.msra.mxu1 %v1815_v9 }
  0x5a   :  { %1507 = vmatprep.subr.mxu0 %v1896_v46  ;;  %1534 = vmatprep.subr.mxu1 %v1817_v10 }
  0x5b   :  { %1508 = vmatpush3.msra.mxu0 %v1896_v46  ;;  %1535 = vmatpush3.msra.mxu1 %v1817_v10 }
  0x5c   :  { %1509 = vmatprep.subr.mxu0 %v1908_v53  ;;  %1536 = vmatprep.subr.mxu1 %v1819_v11 }
  0x5d   :  { %1510 = vmatpush3.msra.mxu0 %v1908_v53  ;;  %1537 = vmatpush3.msra.mxu1 %v1819_v11 }
  0x5e   :  { %1511 = vmatprep.subr.mxu0 %v1920_v60  ;;  %1538 = vmatprep.subr.mxu1 %v1828_v16 }
  0x5f   :  { %1512 = vmatpush3.msra.mxu0 %v1920_v60  ;;  %1539 = vmatpush3.msra.mxu1 %v1828_v16 }
  0x60   :  { %1513 = vmatprep.subr.mxu0 %v1934_v6  ;;  %1540 = vmatprep.subr.mxu1 %v1850_v24 }
  0x61   :  { %1514 = vmatpush3.msra.mxu0 %v1934_v6  ;;  %1541 = vmatpush3.msra.mxu1 %v1850_v24 }
  0x62   :  { %1515 = vmatprep.subr.mxu0 %v1949_v30  ;;  %1542 = vmatprep.subr.mxu1 %v1856_v27 }
  0x63   :  { %1516 = vmatpush3.msra.mxu0 %v1949_v30  ;;  %1543 = vmatpush3.msra.mxu1 %v1856_v27 }
  0x64   :  { %1517 = vmatprep.subr.mxu0 %v1967_v40  ;;  %1544 = vmatprep.subr.mxu1 %v1875_v34 }
  0x65   :  { %1518 = vmatpush3.msra.mxu0 %v1967_v40  ;;  %1545 = vmatpush3.msra.mxu1 %v1875_v34 }
  0x66   :  { %1519 = vmatprep.subr.mxu0 %v1979_v51  ;;  %1546 = vmatprep.subr.mxu1 %v1893_v45 }
  0x67   :  { %1520 = vmatpush3.msra.mxu0 %v1979_v51  ;;  %1547 = vmatpush3.msra.mxu1 %v1893_v45 }
  0x68   :  { %1521 = vmatprep.subr.mxu0 %v1989_v59  ;;  %1548 = vmatprep.subr.mxu1 %v1899_v47 }
  0x69   :  { %1522 = vmatpush3.msra.mxu0 %v1989_v59  ;;  %1523 = vmatprep.mubr.f32.mxu0 %v1946_v25 }
  0x6a   :  { %1549 = vmatpush3.msra.mxu1 %v1899_v47  ;;  %1524 = vmatmul.mubr.f32.vlgmr.msra.gmra.mxu0 %v1955_v32 }
  0x6b   :  { %1550 = vmatprep.subr.mxu1 %v1914_v57  ;;  %1561 = vmatprep.subr.mxu0 %v1842_v21 }
  0x6c   :  { %1551 = vmatpush3.msra.mxu1 %v1914_v57  ;;  %1562 = vmatpush3.msra.mxu0 %v1842_v21 }
  0x6d   :  { %1552 = vmatprep.subr.mxu1 %v1937_v8  ;;  %1563 = vmatprep.subr.mxu0 %v1845_v22 }
  0x6e   :  { %1553 = vmatpush3.msra.mxu1 %v1937_v8  ;;  %1564 = vmatpush3.msra.mxu0 %v1845_v22  ;;  %v765_v22 = vsel %vm760_vm0, %v57_v19, 0 }
  0x6f   :  { %1554 = vmatprep.subr.mxu1 %v1952_v31  ;;  %1565 = vmatprep.subr.mxu0 %v1848_v23 }
  0x70   :  { %1555 = vmatpush3.msra.mxu1 %v1952_v31  ;;  %1566 = vmatpush3.msra.mxu0 %v1848_v23 }
  0x71   :  { %1556 = vmatprep.subr.mxu1 %v1964_v38  ;;  %1567 = vmatprep.subr.mxu0 %v1854_v26 }
  0x72   :  { %1557 = vmatpush3.msra.mxu1 %v1964_v38  ;;  %1558 = vmatprep.mubr.f32.mxu1 %v2192_v14 }
  0x73   :  { %1568 = vmatpush3.msra.mxu0 %v1854_v26  ;;  %1559 = vmatmul.mubr.f32.vlgmr.msra.gmra.mxu1 %v2193_v15 }
  0x74   :  { %1569 = vmatprep.subr.mxu0 %v1859_v28  ;;  %1596 = vmatprep.subr.mxu1 %v1809_v3 }
  0x75   :  { %1570 = vmatpush3.msra.mxu0 %v1859_v28  ;;  %1597 = vmatpush3.msra.mxu1 %v1809_v3  ;;  %v56_v3 = vld [vmem:[#allocation5] sm:$0xff] }
  0x76   :  { %1571 = vmatprep.subr.mxu0 %v1881_v39  ;;  %1598 = vmatprep.subr.mxu1 %v1811_v4 }
  0x77   :  { %1572 = vmatpush3.msra.mxu0 %v1881_v39  ;;  %1599 = vmatpush3.msra.mxu1 %v1811_v4  ;;  %v762_v4 = vsel %vm760_vm0, %v56_v3, 0 }
  0x78   :  { %1573 = vmatprep.subr.mxu0 %v1887_v42  ;;  %1600 = vmatprep.subr.mxu1 %v1813_v5 }
  0x79   :  { %1574 = vmatpush3.msra.mxu0 %v1887_v42  ;;  %1601 = vmatpush3.msra.mxu1 %v1813_v5  ;;  %v2159_v5 = vand.u32 4294901760, %v762_v4 }
  0x7a   :  { %1575 = vmatprep.subr.mxu0 %v1905_v52  ;;  %1602 = vmatprep.subr.mxu1 %v1815_v9 }
  0x7b   :  { %1576 = vmatpush3.msra.mxu0 %v1905_v52  ;;  %1603 = vmatpush3.msra.mxu1 %v1815_v9  ;;  %v2162_v9 = vsub.f32 %v762_v4, %v2159_v5 }
  0x7c   :  { %1577 = vmatprep.subr.mxu0 %v1917_v58  ;;  %1604 = vmatprep.subr.mxu1 %v1817_v10 }
  0x7d   :  { %1578 = vmatpush3.msra.mxu0 %v1917_v58  ;;  %1605 = vmatpush3.msra.mxu1 %v1817_v10  ;;  %v836_v10 = vand.u32 4294901760, %v2162_v9 }
  0x7e   :  { %1579 = vmatprep.subr.mxu0 %v1931_v1  ;;  %1606 = vmatprep.subr.mxu1 %v1819_v11 }
  0x7f   :  { %1580 = vmatpush3.msra.mxu0 %v1931_v1  ;;  %1607 = vmatpush3.msra.mxu1 %v1819_v11  ;;  %v837_v11 = vsub.f32 %v2162_v9, %v836_v10 }
  0x80   :  { %1581 = vmatprep.subr.mxu0 %v1943_v13  ;;  %1608 = vmatprep.subr.mxu1 %v1828_v16 }
  0x81   :  { %1582 = vmatpush3.msra.mxu0 %v1943_v13  ;;  %1609 = vmatpush3.msra.mxu1 %v1828_v16  ;;  %v838_v16 = vand.u32 4294901760, %v837_v11 }
  0x82   :  { %1583 = vmatprep.subr.mxu0 %v1961_v37  ;;  %1610 = vmatprep.subr.mxu1 %v1850_v24 }
  0x83   :  { %1584 = vmatpush3.msra.mxu0 %v1961_v37  ;;  %1611 = vmatpush3.msra.mxu1 %v1850_v24  ;;  %v2169_v24 = vand.u32 4294901760, %v765_v22 }
  0x84   :  { %1585 = vmatprep.subr.mxu0 %v1974_v49  ;;  %1612 = vmatprep.subr.mxu1 %v1856_v27 }
  0x85   :  { %1586 = vmatpush3.msra.mxu0 %v1974_v49  ;;  %1613 = vmatpush3.msra.mxu1 %v1856_v27  ;;  %v845_v33 = vsub.f32 %v765_v22, %v2169_v24 }
  0x86   :  { %1587 = vmatprep.subr.mxu0 %v1986_v56  ;;  %1614 = vmatprep.subr.mxu1 %v1875_v34 }
  0x87   :  { %1588 = vmatpush3.msra.mxu0 %v1986_v56  ;;  %1615 = vmatpush3.msra.mxu1 %v1875_v34 }
  0x88   :  { %1589 = vmatprep.subr.mxu0 %v2002_v12  ;;  %1616 = vmatprep.subr.mxu1 %v1893_v45 }
  0x89   :  { %1590 = vmatpush3.msra.mxu0 %v2002_v12  ;;  %1617 = vmatpush3.msra.mxu1 %v1893_v45 }
  0x8a   :  { %1591 = vmatprep.subr.mxu0 %v2009_v36  ;;  %1618 = vmatprep.subr.mxu1 %v1899_v47 }
  0x8b   :  { %1592 = vmatpush3.msra.mxu0 %v2009_v36  ;;  %1593 = vmatprep.mubr.f32.mxu0 %v1922_v61 }
  0x8c   :  { %1619 = vmatpush3.msra.mxu1 %v1899_v47  ;;  %1594 = vmatmul.mubr.f32.vlgmr.msra.gmra.mxu0 %v1925_v62  ;;  %v846_v47 = vand.u32 4294901760, %v845_v33 }
  0x8d   :  { %1620 = vmatprep.subr.mxu1 %v1914_v57  ;;  %1628 = vmatprep.mubr.f32.mxu1 %v1922_v61 }
  0x8e   :  { %1621 = vmatpush3.msra.mxu1 %v1914_v57  ;;  %1635 = vmatprep.mubr.f32.mxu0 %v838_v16 }
  0x8f   :  { %1622 = vmatprep.subr.mxu1 %v1937_v8 }
  0x90   :  { %1623 = vmatpush3.msra.mxu1 %v1937_v8 }
  0x91   :  { %1624 = vmatprep.subr.mxu1 %v1952_v31 }
  0x92   :  { %1625 = vmatpush3.msra.mxu1 %v1952_v31 }
  0x93   :  { %1626 = vmatprep.subr.mxu1 %v1964_v38 }
  0x94   :  { %1627 = vmatpush3.msra.mxu1 %v1964_v38 }
  0x95   :  { %1629 = vmatmul.mubr.f32.vlgmr.msra.gmra.mxu1 %v1925_v62  ;;  %v847_v62 = vsub.f32 %v845_v33, %v846_v47 }
  0x96   :  { %1642 = vmatprep.mubr.f32.mxu1 %v2159_v5 }
  0x97   :  { %v848_v30 = vand.u32 4294901760, %v847_v62 }
 0x109   :  { %v1455_v17 = vpop.f32.mrf.mxu0 }
 0x10b   :  { %v163_v20 = vpop.f32.mrf.mxu0 }
 0x111   :  { %v1490_v21 = vpop.f32.mrf.mxu1 }
 0x112   :  { %v331_v29 = vadd.f32 %v1490_v21, %v1455_v17 }
 0x113   :  { %v324_v26 = vpop.f32.mrf.mxu1 }
 0x114   :  { %v325_v39 = vadd.f32 %v324_v26, %v163_v20 }
 0x12a   :  { %v1525_v23 = vpop.f32.mrf.mxu0 }
 0x12b   :  { %v442_v42 = vadd.f32 %v1525_v23, %v331_v29 }
 0x12c   :  { %v434_v27 = vpop.f32.mrf.mxu0 }
 0x12d   :  { %v435_v45 = vadd.f32 %v434_v27, %v325_v39 }
 0x133   :  { %v1560_v28 = vpop.f32.mrf.mxu1 }
 0x134   :  { %v539_v46 = vadd.f32 %v1560_v28, %v442_v42 }
 0x135   :  { %v530_v43 = vpop.f32.mrf.mxu1 }
 0x136   :  { %v531_v53 = vadd.f32 %v530_v43, %v435_v45 }
 0x14c   :  { %v1595_v34 = vpop.f32.mrf.mxu0 }
 0x14d   :  { %v664_v57 = vadd.f32 %v1595_v34, %v539_v46 }
 0x14e   :  { %v657_v52 = vpop.f32.mrf.mxu0 }
 0x14f   :  { %v658_v60 = vadd.f32 %v657_v52, %v531_v53 }
 0x155   :  { %v1630_v58 = vpop.f32.mrf.mxu1 }
 0x156   :  { %v757_v61 = vadd.f32 %v1630_v58, %v664_v57 }
 0x157   :  { %v750_v1 = vpop.f32.mrf.mxu1 }
 0x158   :  { %v796_v6 = vand.u32 4294901760, %v757_v61  ;;  %v751_v8 = vadd.f32 %v750_v1, %v658_v60 }
 0x15a   :  { %v884_v13 = vsub.f32 %v757_v61, %v796_v6  ;;  %v799_v25 = vand.u32 4294901760, %v751_v8  ;;  %1631 = vmatprep.subr.mxu0 %v796_v6 }
 0x15b   :  { %1632 = vmatpush3.msra.mxu0 %v796_v6 }
 0x15c   :  { %v891_v31 = vsub.f32 %v751_v8, %v799_v25  ;;  %1633 = vmatprep.subr.mxu0 %v799_v25  ;;  %v885_v32 = vand.u32 4294901760, %v884_v13 }
 0x15d   :  { %1634 = vmatpush3.msra.mxu0 %v799_v25 }
 0x15e   :  { %1645 = vmatprep.subr.mxu0 %v884_v13  ;;  %1636 = vmatmul.mubr.f32.vlgmr.msra.gmra.mxu0 %v848_v30  ;;  %v886_v37 = vsub.f32 %v884_v13, %v885_v32  ;;  %v892_v38 = vand.u32 4294901760, %v891_v31 }
 0x15f   :  { %1646 = vmatpush3.msra.mxu0 %v884_v13  ;;  %1649 = vmatprep.mubr.f32.mxu0 %v2162_v9 }
 0x160   :  { %1647 = vmatprep.subr.mxu0 %v891_v31  ;;  %v887_v40 = vand.u32 4294901760, %v886_v37  ;;  %v893_v48 = vsub.f32 %v891_v31, %v892_v38 }
 0x161   :  { %1648 = vmatpush3.msra.mxu0 %v891_v31 }
 0x162   :  { %1638 = vmatprep.subr.mxu1 %v887_v40  ;;  %1659 = vmatprep.subr.mxu0 %v885_v32  ;;  %v894_v49 = vand.u32 4294901760, %v893_v48 }
 0x163   :  { %1639 = vmatpush3.msra.mxu1 %v887_v40  ;;  %1650 = vmatmul.mubr.f32.vlgmr.msra.gmra.mxu0 %v845_v33 }
 0x164   :  { %1660 = vmatpush3.msra.mxu0 %v885_v32  ;;  %1640 = vmatprep.subr.mxu1 %v894_v49 }
 0x165   :  { %1661 = vmatprep.subr.mxu0 %v892_v38  ;;  %1641 = vmatpush3.msra.mxu1 %v894_v49 }
 0x166   :  { %1662 = vmatpush3.msra.mxu0 %v892_v38  ;;  %1643 = vmatmul.mubr.f32.vlgmr.msra.gmra.mxu1 %v2169_v24 }
 0x167   :  { %1652 = vmatprep.subr.mxu1 %v796_v6  ;;  %1656 = vmatprep.mubr.f32.mxu1 %v836_v10 }
 0x168   :  { %1653 = vmatpush3.msra.mxu1 %v796_v6  ;;  %1663 = vmatprep.mubr.f32.mxu0 %v2159_v5 }
 0x169   :  { %1654 = vmatprep.subr.mxu1 %v799_v25  ;;  %1664 = vmatmul.mubr.f32.vlgmr.msra.gmra.mxu0 %v2169_v24 }
 0x16a   :  { %1655 = vmatpush3.msra.mxu1 %v799_v25 }
 0x16b   :  { %1657 = vmatmul.mubr.f32.vlgmr.msra.gmra.mxu1 %v846_v47  ;;  %1666 = vmatprep.subr.mxu1 %v796_v6 }
 0x16c   :  { %1667 = vmatpush3.msra.mxu1 %v796_v6  ;;  %1670 = vmatprep.mubr.f32.mxu1 %v2159_v5 }
 0x16d   :  { %1668 = vmatprep.subr.mxu1 %v799_v25 }
 0x16e   :  { %1669 = vmatpush3.msra.mxu1 %v799_v25 }
 0x16f   :  { %1671 = vmatmul.mubr.f32.vlgmr.msra.gmra.mxu1 %v2169_v24 }
 0x21e   :  { %v1637_v50 = vpop.f32.mrf.mxu0 }
 0x220   :  { %v840_v51 = vpop.f32.mrf.mxu0 }
 0x223   :  { %v1651_v56 = vpop.f32.mrf.mxu0 }
 0x225   :  { %v1013_v7 = vpop.f32.mrf.mxu0 }
 0x226   :  { %v1644_v59 = vpop.f32.mrf.mxu1 }
 0x227   :  { %v938_v2 = vadd.f32 %v1644_v59, %v1637_v50 }
 0x228   :  { %v931_v12 = vpop.f32.mrf.mxu1 }
 0x229   :  { %v1021_v18 = vadd.f32 %v1651_v56, %v938_v2  ;;  %v932_v35 = vadd.f32 %v931_v12, %v840_v51  ;;  %v1665_v44 = vpop.f32.mrf.mxu0 }
 0x22b   :  { %v1014_v36 = vadd.f32 %v1013_v7, %v932_v35  ;;  %v1658_v41 = vpop.f32.mrf.mxu1  ;;  %v1180_v14 = vpop.f32.mrf.mxu0 }
 0x22c   :  { %v1104_v55 = vadd.f32 %v1658_v41, %v1021_v18 }
 0x22d   :  { %v1095_v54 = vpop.f32.mrf.mxu1 }
 0x22e   :  { %v1187_v63 = vadd.f32 %v1665_v44, %v1104_v55  ;;  %v1096_v0 = vadd.f32 %v1095_v54, %v1014_v36 }
 0x22f   :  { %v1672_v15 = vpop.f32.mrf.mxu1 }
 0x230   :  { %v1181_v3 = vadd.f32 %v1180_v14, %v1096_v0  ;;  %v1266_v4 = vadd.f32 %v1672_v15, %v1187_v63 }
 0x231   :  { %v1259_v5 = vpop.f32.mrf.mxu1 }
 0x232   :  { %1270 = vst [vmem:[#allocation8 + $0x8] sm:$0xff] %v1266_v4  ;;  %v1260_v9 = vadd.f32 %v1259_v5, %v1181_v3 }
 0x234   :  { %1269 = vst [vmem:[#allocation8] sm:$0xff] %v1260_v9 }
 0x235   :  { %1750 = shalt.err (!%p1747_p5)
}
 0x236   :  { %1282 = dma.vmem_to_hbm [thread:$0]  %s1277_s2, 256, %s2189_s3, [#allocation4], %s1767_s17, %s1767_s17, %s1768_s18  }
 0x237   :  { %1763 = dma.done.wait [#allocation4], 256  }
 0x238   :  { %1764 = vsyncadd [#allocation4], 4294967040 }
 0x239   :  { %1286 = vsyncpa [#allocation3], 1 }
 0x23a   :  { %1287 = vsyncpa [#allocation6], 1 }
 0x23b   :  { %1288 = vsyncpa [#allocation4], 1 }

</bundles_post_ra>
